<compile_context>
chip_gen: v5e
topology: v5e:2x2
jax: 0.10.0
libtpu: 0.0.40
codegen_flags: <defaults>
</compile_context>

<pallas_src>
import functools

import jax
import jax.numpy as jnp
from jax.experimental import pallas as pl
from jax.experimental.pallas import tpu as pltpu


def _label_smoothing_kernel(x_ref, tgt_ref, out_ref, *, smoothing, n_rows,
                            num_classes, tm):
    # x_ref: (TM, C) logits, tgt_ref: (TM, 1) int32 class ids,
    # out_ref: (TM, 1) f32 per-row loss (0 for padded rows).
    i = pl.program_id(0)

    x = x_ref[...].astype(jnp.float32)                    # (TM, C)
    tgt = tgt_ref[...]                                    # (TM, 1) int32

    # Numerically stable log-sum-exp along the class (lane) axis.
    m = jnp.max(x, axis=-1, keepdims=True)                # (TM, 1)
    shifted = x - m                                       # (TM, C)
    lse = jnp.log(jnp.sum(jnp.exp(shifted), axis=-1, keepdims=True))  # (TM, 1)

    # Fused nll + smooth reductions:
    #   loss = confidence*(lse - shifted[tgt]) + smoothing*(lse - mean(shifted))
    #        = lse - sum(shifted * w),  w = smoothing/C + confidence*onehot
    # (valid because sum(w) == confidence + smoothing == 1).
    confidence = 1.0 - smoothing
    uni = smoothing / num_classes
    col = jax.lax.broadcasted_iota(jnp.int32, x.shape, 1)          # (TM, C)
    w = jnp.where(col == tgt, confidence + uni, uni)               # (TM, C)
    loss = lse - jnp.sum(shifted * w, axis=-1, keepdims=True)      # (TM, 1)

    # Zero out rows past the true batch size (padded partial last tile).
    row = i * tm + jax.lax.broadcasted_iota(jnp.int32, (tm, 1), 0)  # (TM, 1)
    loss = jnp.where(row < n_rows, loss, 0.0)

    out_ref[...] = loss


def _round_up(a, b):
    return ((a + b - 1) // b) * b


def label_smoothing_loss(x, target, smoothing=0.1, tm=None):
    """x: (N, C) float logits (f32 or bf16), target: (N,) int class ids -> scalar f32."""
    N, C = x.shape
    itemsize = jnp.dtype(x.dtype).itemsize

    if tm is None:
        # Aim for ~2 MiB input tiles (well inside the default scoped VMEM with
        # double buffering), capped at 1024 rows; multiple of 16 for bf16 tiles.
        tm = (2 * 1024 * 1024) // max(C * itemsize, 1)
        tm = int(min(1024, max(16, tm)))
    tm = min(tm, _round_up(N, 16))
    tm = max(16, (tm // 16) * 16)

    num_tiles = int(pl.cdiv(N, tm))
    n_pad = num_tiles * tm

    tgt2 = target.astype(jnp.int32).reshape(N, 1)

    kernel = functools.partial(
        _label_smoothing_kernel,
        smoothing=float(smoothing),
        n_rows=N,
        num_classes=C,
        tm=tm,
    )

    per_row = pl.pallas_call(
        kernel,
        out_shape=jax.ShapeDtypeStruct((n_pad, 1), jnp.float32),
        grid=(num_tiles,),
        in_specs=[
            pl.BlockSpec((tm, C), lambda i: (i, 0)),   # logits row tile
            pl.BlockSpec((tm, 1), lambda i: (i, 0)),   # targets row tile
        ],
        out_specs=pl.BlockSpec((tm, 1), lambda i: (i, 0)),
        compiler_params=pltpu.CompilerParams(
            dimension_semantics=("parallel",)),
        cost_estimate=pl.CostEstimate(
            flops=int(6 * N * C),
            transcendentals=int(N * C),
            bytes_accessed=int(N * C * itemsize + N * 4 + n_pad * 4)),
    )(x, tgt2)

    # Final mean over the true batch (padded rows were zeroed in-kernel).
    return jnp.sum(per_row) / jnp.float32(N)


if __name__ == "__main__":
    key = jax.random.PRNGKey(0)
    k_x, k_t = jax.random.split(key)

    N, C = 16, 128          # small batch, 128 classes (lane-aligned)
    smoothing = 0.1

    x = jax.random.normal(k_x, (N, C), dtype=jnp.float32)
    target = jax.random.randint(k_t, (N,), 0, C, dtype=jnp.int32)

    loss = label_smoothing_loss(x, target, smoothing=smoothing)
    loss = jax.block_until_ready(loss)

    # Reference check in plain JAX (same math as the PyTorch module).
    logprobs = jax.nn.log_softmax(x, axis=-1)
    nll = -jnp.take_along_axis(logprobs, target[:, None], axis=-1)[:, 0]
    smooth = -jnp.mean(logprobs, axis=-1)
    ref = jnp.mean((1.0 - smoothing) * nll + smoothing * smooth)

    assert jnp.allclose(loss, ref, atol=1e-5, rtol=1e-5), (loss, ref)
    print("KERNEL_OK")
</pallas_src>

<mosaic_0001>
module attributes {stable_mosaic.version = 11 : i64} {
  func.func @_label_smoothing_kernel(%arg0: i32, %arg1: memref<16x128xf32, #tpu.memory_space<vmem>>, %arg2: memref<16x1xi32, #tpu.memory_space<vmem>>, %arg3: memref<16x1xf32, #tpu.memory_space<vmem>>) attributes {dimension_semantics = [#tpu.dimension_semantics<parallel>], iteration_bounds = array<i64: 1>, scalar_prefetch = 0 : i64, scratch_operands = 0 : i64, tpu.core_type = #tpu.core_type<tc>, window_params = [{transform_indices = @transform_0, window_bounds = array<i64: 16, 128>}, {transform_indices = @transform_1, window_bounds = array<i64: 16, 1>}, {transform_indices = @transform_2, window_bounds = array<i64: 16, 1>}]} {
    %c0 = arith.constant 0 : index
    %c0_0 = arith.constant 0 : index
    %0 = vector.load %arg1[%c0, %c0_0] : memref<16x128xf32, #tpu.memory_space<vmem>>, vector<16x128xf32>
    %c0_1 = arith.constant 0 : index
    %c0_2 = arith.constant 0 : index
    %1 = vector.load %arg2[%c0_1, %c0_2] : memref<16x1xi32, #tpu.memory_space<vmem>>, vector<16x1xi32>
    %cst = arith.constant dense<0xFF800000> : vector<16xf32>
    %2 = vector.multi_reduction <maximumf>, %0, %cst [1] : vector<16x128xf32> to vector<16xf32>
    %3 = vector.shape_cast %2 : vector<16xf32> to vector<16x1xf32>
    %4 = vector.broadcast %3 : vector<16x1xf32> to vector<16x128xf32>
    %5 = arith.subf %0, %4 : vector<16x128xf32>
    %6 = math.exp %5 : vector<16x128xf32>
    %cst_3 = arith.constant dense<0.000000e+00> : vector<16xf32>
    %7 = vector.multi_reduction <add>, %6, %cst_3 [1] : vector<16x128xf32> to vector<16xf32>
    %8 = vector.shape_cast %7 : vector<16xf32> to vector<16x1xf32>
    %9 = math.log %8 : vector<16x1xf32>
    %10 = tpu.iota {dimensions = array<i32: 1>} : vector<16x128xi32>
    %11 = vector.broadcast %1 : vector<16x1xi32> to vector<16x128xi32>
    %12 = arith.cmpi eq, %10, %11 : vector<16x128xi32>
    %cst_4 = arith.constant 0.900781273 : f32
    %cst_5 = arith.constant 7.812500e-04 : f32
    %13 = vector.broadcast %cst_4 : f32 to vector<16x128xf32>
    %14 = vector.broadcast %cst_5 : f32 to vector<16x128xf32>
    %15 = arith.select %12, %13, %14 : vector<16x128xi1>, vector<16x128xf32>
    %16 = arith.mulf %5, %15 : vector<16x128xf32>
    %cst_6 = arith.constant dense<0.000000e+00> : vector<16xf32>
    %17 = vector.multi_reduction <add>, %16, %cst_6 [1] : vector<16x128xf32> to vector<16xf32>
    %18 = vector.shape_cast %17 : vector<16xf32> to vector<16x1xf32>
    %19 = arith.subf %9, %18 : vector<16x1xf32>
    %c16_i32 = arith.constant 16 : i32
    %20 = arith.muli %arg0, %c16_i32 : i32
    %21 = tpu.iota {dimensions = array<i32: 0>} : vector<16x1xi32>
    %22 = vector.broadcast %20 : i32 to vector<16x1xi32>
    %23 = arith.addi %22, %21 : vector<16x1xi32>
    %c16_i32_7 = arith.constant 16 : i32
    %24 = vector.broadcast %c16_i32_7 : i32 to vector<16x1xi32>
    %25 = arith.cmpi slt, %23, %24 : vector<16x1xi32>
    %cst_8 = arith.constant 0.000000e+00 : f32
    %26 = vector.broadcast %cst_8 : f32 to vector<16x1xf32>
    %27 = arith.select %25, %19, %26 : vector<16x1xi1>, vector<16x1xf32>
    %c0_9 = arith.constant 0 : index
    %c0_10 = arith.constant 0 : index
    %28 = vector.load %arg3[%c0_9, %c0_10] : memref<16x1xf32, #tpu.memory_space<vmem>>, vector<16x1xf32>
    tpu.vector_store %arg3[%c0_9, %c0_10], %27 {strides = array<i32>} : memref<16x1xf32, #tpu.memory_space<vmem>>, vector<16x1xf32>,
    return
  }
  func.func @transform_0(%arg0: i32) -> (i32, i32) {
    %c0_i32 = arith.constant 0 : i32
    %c0_i32_0 = arith.constant 0 : i32
    return %arg0, %c0_i32 : i32, i32
  }
  func.func @transform_1(%arg0: i32) -> (i32, i32) {
    %c0_i32 = arith.constant 0 : i32
    %c0_i32_0 = arith.constant 0 : i32
    return %arg0, %c0_i32 : i32, i32
  }
  func.func @transform_2(%arg0: i32) -> (i32, i32) {
    %c0_i32 = arith.constant 0 : i32
    %c0_i32_0 = arith.constant 0 : i32
    return %arg0, %c0_i32 : i32, i32
  }
}

</mosaic_0001>

<bundles_post_ra>
// kernel: tpu_custom_call.1
= control target key start
LH: loop header
LB: loop body
LE: loop exit
PB: predicated region body
PF: predicated region fallthrough
CT: control target
= control target key end

     0   :  { %v83_v0 = vmov 0   ;;  %v33_v5 = vlaneseq  ;;  %v84_v9 = vmov 0.00078125   ;;  %vm64_vm2 = vcmask 7168   ;;  %s118_s0 = inlined_call_operand.vmem [shape: f32[16,128], index: 0, kind: input, shape index: {}]   ;;  %s119_s1 = inlined_call_operand.vmem [shape: s32[16,1], index: 1, kind: input, shape index: {}]   ;;  %s120_s2 = inlined_call_operand.vmem [shape: f32[16,1], index: 2, kind: output, shape index: {}]  }
   0x1   :  { %73 = vset.pattern.permute.xlu1 %v83_v0  ;;  %v11_v1 = vld [vmem:[%s118_s0] sm:$0xff]  ;;  %74 = vset.pattern.permute.xlu0 %v83_v0  ;;  %v12_v3 = vld [vmem:[%s118_s0 + $0x8] sm:$0xff] }
   0x2   :  { %v13_v2 = vld [vmem:[%s119_s1] sm:$0xff]  ;;  %15 = vmax.xlane.f32.xlu0 %v11_v1  ;;  %v14_v4 = vld [vmem:[%s119_s1 + $0x8] sm:$0xff]  ;;  %v34_v6 = vand.u32 127, %v33_v5 }
   0x3   :  { %36 = vperm.xlu1 %73, %v13_v2  }
   0xa   :  { %17 = vmax.xlane.f32.xlu0 %v12_v3 }
   0xb   :  { %39 = vperm.xlu1 %73, %v14_v4  }
  0x75   :  { %v37_v7 = vpop.permute.xlu1 %36  ;;  %v16_v8 = vpop.xlane.xlu0 %15 }
  0x76   :  { %vm41_vm0 = vcmp.eq.s32.totalorder %v34_v6, %v37_v7  ;;  %v19_v11 = vsub.f32 %v11_v1, %v16_v8 }
  0x77   :  { %v43_v10 = vsel %vm41_vm0, 0.9007813, %v84_v9 }
  0x78   :  { %v45_v12 = vmul.f32 %v43_v10, %v19_v11  ;;  %v21_v13 = vmul.f32 1.442695, %v19_v11 }
  0x7a   :  { %47 = vadd.xlane.f32.xlu0 %v45_v12  ;;  %75 = vpow2.f32 %v21_v13 }
  0x7d   :  { %v40_v14 = vpop.permute.xlu1 %39  ;;  %v18_v15 = vpop.xlane.xlu0 %17 }
  0x7e   :  { %vm42_vm1 = vcmp.eq.s32.totalorder %v34_v6, %v40_v14  ;;  %v20_v17 = vsub.f32 %v12_v3, %v18_v15 }
  0x7f   :  { %v44_v16 = vsel %vm42_vm1, 0.9007813, %v84_v9 }
  0x80   :  { %v76_v18 = vpop.eup %75  ;;  %v23_v19 = vmul.f32 1.442695, %v20_v17  ;;  %v46_v20 = vmul.f32 %v44_v16, %v20_v17 }
  0x81   :  { %25 = vadd.xlane.f32.xlu2 %v76_v18 }
  0x82   :  { %77 = vpow2.f32 %v23_v19  ;;  %49 = vadd.xlane.f32.xlu1 %v46_v20 }
  0x88   :  { %v78_v21 = vpop.eup %77 }
  0x89   :  { %27 = vadd.xlane.f32.xlu2 %v78_v21 }
  0xed   :  { %v48_v26 = vpop.xlane.xlu0 %47 }
  0xf4   :  { %v26_v22 = vpop.xlane.xlu2 %25 }
  0xf5   :  { %79 = vlog2.f32 %v26_v22  ;;  %v50_v30 = vpop.xlane.xlu1 %49 }
  0xfb   :  { %v80_v23 = vpop.eup %79 }
  0xfc   :  { %v30_v24 = vmul.f32 0.6931472, %v80_v23  ;;  %v28_v25 = vpop.xlane.xlu2 %27 }
  0xfd   :  { %81 = vlog2.f32 %v28_v25 }
  0xfe   :  { %v51_v27 = vsub.f32 %v30_v24, %v48_v26 }
 0x100   :  { %65 = vst.msk [vmem:[%s120_s2] sm:$0xff] %vm64_vm2, %v51_v27 }
 0x103   :  { %v82_v28 = vpop.eup %81 }
 0x104   :  { %v32_v29 = vmul.f32 0.6931472, %v82_v28 }
 0x106   :  { %v52_v31 = vsub.f32 %v32_v29, %v50_v30 }
 0x108   :  { %66 = vst.msk [vmem:[%s120_s2 + $0x8] sm:$0xff] %vm64_vm2, %v52_v31 }

</bundles_post_ra>
